<compile_context>
chip_gen: v7x
topology: tpu7x:2x2x1
jax: 0.10.0
libtpu: 0.0.40
codegen_flags: <defaults>
</compile_context>

<pallas_src>
import functools

import numpy as np

import jax
import jax.numpy as jnp
from jax import lax
from jax.experimental import pallas as pl
from jax.experimental.pallas import tpu as pltpu


# ----------------------------- Pallas kernel -----------------------------
def _detnet_kernel(x_ref, wa_ref, w2_ref, w3_ref, b_ref, m_ref, o_ref, *, W, P):
    Sp = x_ref.shape[-1]                       # lane extent (H*W padded to 128k)

    x = x_ref[0].astype(jnp.bfloat16)          # (C_IN, Sp) bf16 MXU operand

    # ---- conv1 + downsample (both 1x1, BN folded): ONE bf16 MXU pass ----
    h = jnp.dot(wa_ref[...], x, preferred_element_type=jnp.float32)   # (2P, Sp) f32
    h1 = jnp.maximum(h[:P, :] + b_ref[:, 0:1], 0.0)                   # bn1 + relu
    ds = h[P:, :] + b_ref[:, 1:2]                                     # shortcut (bn)

    # ---- conv2: 3x3, dilation 2, padding 2 via rolled taps * validity masks ----
    masks = m_ref[...]                         # (9, Sp) f32, precomputed on host
    w2 = w2_ref[...]                           # (P, 9P) bf16

    def tap(t):
        dy = (t // 3) * 2 - 2                  # dilation-2 row offset
        dx = (t % 3) * 2 - 2                   # dilation-2 col offset
        off = dy * W + dx                      # source offset on flattened spatial
        rolled = h1 if off == 0 else pltpu.roll(h1, (-off) % Sp, axis=1)
        if dy == 0 and dx == 0:
            return rolled                      # center tap: always valid
        return rolled * masks[t:t + 1, :]      # zero out-of-image / padded sources

    if P >= 128:
        # Production sizes: per-tap accumulate -> no (9P, Sp) staging slab.
        h2 = jnp.zeros((P, Sp), jnp.float32)
        for t in range(9):
            h2 = h2 + jnp.dot(w2[:, t * P:(t + 1) * P],
                              tap(t).astype(jnp.bfloat16),
                              preferred_element_type=jnp.float32)
    else:
        # Tiny P: one fused K = 9P matmul keeps the MXU pass count low.
        tmat = jnp.concatenate([tap(t) for t in range(9)], axis=0)     # (9P, Sp) f32
        h2 = jnp.dot(w2, tmat.astype(jnp.bfloat16),
                     preferred_element_type=jnp.float32)                # (P, Sp)
    h2 = jnp.maximum(h2 + b_ref[:, 2:3], 0.0)                           # bn2 + relu

    # ---- conv3 (1x1) + bn3, residual add, relu ----
    h3 = jnp.dot(w3_ref[...], h2.astype(jnp.bfloat16),
                 preferred_element_type=jnp.float32) + b_ref[:, 3:4]
    o_ref[0] = jnp.maximum(h3 + ds, 0.0)


# ----------------------------- wrapper -----------------------------
@jax.jit
def detnet_bottleneck(x_nchw, params):
    """PyTorch-semantics forward (inference-mode BN folded): NCHW in -> NCHW out."""
    N, C_IN, H, W = x_nchw.shape
    P = params["w3"].shape[0]
    S = H * W
    Sp = ((S + 127) // 128) * 128              # lane-dense spatial extent

    x_flat = x_nchw.reshape(N, C_IN, S)        # contiguous reshape, no transpose
    if Sp != S:
        x_flat = jnp.pad(x_flat, ((0, 0), (0, 0), (0, Sp - S)))

    # Per-tap source-validity masks (integer row/col math, computed once on the
    # host at trace time -> baked constants).  Padded lanes are never valid.
    r = np.arange(H)[:, None]
    c = np.arange(W)[None, :]
    masks = np.zeros((9, Sp), np.float32)
    for t in range(9):
        dy = (t // 3) * 2 - 2
        dx = (t % 3) * 2 - 2
        valid = (r + dy >= 0) & (r + dy < H) & (c + dx >= 0) & (c + dx < W)
        masks[t, :S] = valid.reshape(-1).astype(np.float32)
    masks = jnp.asarray(masks)

    kernel = functools.partial(_detnet_kernel, W=W, P=P)
    full = lambda a: pl.BlockSpec(a.shape, lambda n: (0,) * a.ndim)

    out_flat = pl.pallas_call(
        kernel,
        out_shape=jax.ShapeDtypeStruct((N, P, Sp), jnp.float32),
        grid=(N,),
        in_specs=[
            pl.BlockSpec((1, C_IN, Sp), lambda n: (n, 0, 0)),
            full(params["wa"]),     # (2P, C_IN) bf16  conv1 | downsample (BN-folded)
            full(params["w2"]),     # (P, 9P)    bf16  conv2 im2col weights (BN-folded)
            full(params["w3"]),     # (P, P)     bf16  conv3 (BN-folded)
            full(params["b"]),      # (P, 4)     f32   biases [b1, bd, b2, b3]
            full(masks),            # (9, Sp)    f32   conv2 tap validity masks
        ],
        out_specs=pl.BlockSpec((1, P, Sp), lambda n: (n, 0, 0)),
        # NOTE: at production DetNet sizes (P=256, C_IN=1024) add
        # pipeline_mode=pl.Buffered(1) on the constant weight specs (or raise
        # vmem_limit_bytes) so they are not double-buffered under v7x's 64 MiB VMEM.
        compiler_params=pltpu.CompilerParams(
            dimension_semantics=("parallel",)),   # v7x: 2 TCs split the batch
    )(x_flat, params["wa"], params["w2"], params["w3"], params["b"], masks)

    return out_flat[:, :, :S].reshape(N, P, H, W)


# ----------------------------- parameter folding -----------------------------
def _fold_bn(gamma, beta, mean, var, eps=1e-5):
    scale = gamma / jnp.sqrt(var + eps)
    return scale, beta - mean * scale


def fold_detnet_params(raw, eps=1e-5):
    """Fold OIHW conv weights + inference-mode BatchNorm into the kernel's slabs.

    If raw has no 'wd'/'bnd' entries the shortcut is the identity (in_planes ==
    planes, block_type 'A').
    """
    # TODO(synk): stride != 1 (strided conv2 + strided downsample) not implemented;
    # DetNet uses stride=1 for these blocks.
    s1, b1 = _fold_bn(*raw["bn1"], eps=eps)
    s2, b2 = _fold_bn(*raw["bn2"], eps=eps)
    s3, b3 = _fold_bn(*raw["bn3"], eps=eps)
    P, C_IN = raw["w1"].shape[:2]

    w1 = raw["w1"][:, :, 0, 0] * s1[:, None]                   # (P, C_IN)
    if "wd" in raw:
        sd, bd = _fold_bn(*raw["bnd"], eps=eps)
        wd = raw["wd"][:, :, 0, 0] * sd[:, None]               # (P, C_IN)
    else:                                                      # identity shortcut
        assert C_IN == P, "identity shortcut requires in_planes == planes"
        wd = jnp.eye(P, dtype=jnp.float32)
        bd = jnp.zeros((P,), jnp.float32)
    wa = jnp.concatenate([w1, wd], axis=0).astype(jnp.bfloat16)  # (2P, C_IN)

    w2 = raw["w2"] * s2[:, None, None, None]                   # (P, P, 3, 3) OIHW
    w2 = jnp.transpose(w2, (0, 2, 3, 1)).reshape(P, 9 * P)     # (P, 9P): (ky*3+kx)*P + c
    w2 = w2.astype(jnp.bfloat16)

    w3 = (raw["w3"][:, :, 0, 0] * s3[:, None]).astype(jnp.bfloat16)   # (P, P)
    b = jnp.stack([b1, bd, b2, b3], axis=1)                    # (P, 4) f32
    return dict(wa=wa, w2=w2, w3=w3, b=b)


# ----------------------------- reference (pure JAX, f32) -----------------------------
def _reference_nchw(x, raw, eps=1e-5):
    dn = ("NCHW", "OIHW", "NCHW")

    def bn(h, p):
        gamma, beta, mean, var = p
        s = gamma / jnp.sqrt(var + eps)
        b = beta - mean * s
        return h * s[None, :, None, None] + b[None, :, None, None]

    h = lax.conv_general_dilated(x, raw["w1"], (1, 1), "VALID", dimension_numbers=dn)
    h = jnp.maximum(bn(h, raw["bn1"]), 0.0)
    h = lax.conv_general_dilated(h, raw["w2"], (1, 1), ((2, 2), (2, 2)),
                                 rhs_dilation=(2, 2), dimension_numbers=dn)
    h = jnp.maximum(bn(h, raw["bn2"]), 0.0)
    h = lax.conv_general_dilated(h, raw["w3"], (1, 1), "VALID", dimension_numbers=dn)
    h = bn(h, raw["bn3"])
    d = lax.conv_general_dilated(x, raw["wd"], (1, 1), "VALID", dimension_numbers=dn)
    d = bn(d, raw["bnd"])
    return jnp.maximum(h + d, 0.0)


if __name__ == "__main__":
    N, C_IN, H, W = 2, 4, 16, 16      # NCHW, as the PyTorch module expects
    PLANES = 8                        # in_planes != planes -> downsample branch active

    key = jax.random.PRNGKey(0)
    ks = jax.random.split(key, 9)

    def bn_raw(k, c):
        k1, k2, k3, k4 = jax.random.split(k, 4)
        return (jax.random.uniform(k1, (c,), jnp.float32, 0.5, 1.5),   # gamma
                jax.random.normal(k2, (c,), jnp.float32) * 0.1,        # beta
                jax.random.normal(k3, (c,), jnp.float32) * 0.1,        # running mean
                jax.random.uniform(k4, (c,), jnp.float32, 0.5, 1.5))   # running var

    raw = dict(
        w1=jax.random.normal(ks[0], (PLANES, C_IN, 1, 1), jnp.float32) * 0.2,
        w2=jax.random.normal(ks[1], (PLANES, PLANES, 3, 3), jnp.float32) * 0.1,
        w3=jax.random.normal(ks[2], (PLANES, PLANES, 1, 1), jnp.float32) * 0.2,
        wd=jax.random.normal(ks[3], (PLANES, C_IN, 1, 1), jnp.float32) * 0.2,
        bn1=bn_raw(ks[4], PLANES),
        bn2=bn_raw(ks[5], PLANES),
        bn3=bn_raw(ks[6], PLANES),
        bnd=bn_raw(ks[7], PLANES),
    )
    x_nchw = jax.random.normal(ks[8], (N, C_IN, H, W), jnp.float32)

    params = fold_detnet_params(raw)
    out = detnet_bottleneck(x_nchw, params)
    out = jax.block_until_ready(out)

    ref = _reference_nchw(x_nchw, raw)
    assert out.shape == (N, PLANES, H, W)
    # bf16 MXU operands (f32 accumulation) -> looser tolerance than the pure-f32 ref.
    assert jnp.allclose(out, ref, atol=5e-2, rtol=5e-2), (
        f"mismatch vs reference, max abs err {jnp.max(jnp.abs(out - ref)):.3e}")
    print("KERNEL_OK")
</pallas_src>

<mosaic_0001>
module attributes {stable_mosaic.version = 11 : i64} {
  func.func @_detnet_kernel(%arg0: i32, %arg1: memref<1x4x256xf32, #tpu.memory_space<vmem>>, %arg2: memref<16x4xbf16, #tpu.memory_space<vmem>>, %arg3: memref<8x72xbf16, #tpu.memory_space<vmem>>, %arg4: memref<8x8xbf16, #tpu.memory_space<vmem>>, %arg5: memref<8x4xf32, #tpu.memory_space<vmem>>, %arg6: memref<9x256xf32, #tpu.memory_space<vmem>>, %arg7: memref<1x8x256xf32, #tpu.memory_space<vmem>>) attributes {dimension_semantics = [#tpu.dimension_semantics<parallel>], iteration_bounds = array<i64: 2>, scalar_prefetch = 0 : i64, scratch_operands = 0 : i64, tpu.core_type = #tpu.core_type<tc>, window_params = [{transform_indices = @transform_0, window_bounds = array<i64: 1, 4, 256>}, {pipeline_mode = #tpu.pipeline_mode<synchronous>, transform_indices = @transform_1, window_bounds = array<i64: 16, 4>}, {pipeline_mode = #tpu.pipeline_mode<synchronous>, transform_indices = @transform_2, window_bounds = array<i64: 8, 72>}, {pipeline_mode = #tpu.pipeline_mode<synchronous>, transform_indices = @transform_3, window_bounds = array<i64: 8, 8>}, {pipeline_mode = #tpu.pipeline_mode<synchronous>, transform_indices = @transform_4, window_bounds = array<i64: 8, 4>}, {pipeline_mode = #tpu.pipeline_mode<synchronous>, transform_indices = @transform_5, window_bounds = array<i64: 9, 256>}, {transform_indices = @transform_6, window_bounds = array<i64: 1, 8, 256>}]} {
    %c0 = arith.constant 0 : index
    %c0_0 = arith.constant 0 : index
    %c0_1 = arith.constant 0 : index
    %0 = vector.load %arg1[%c0, %c0_0, %c0_1] : memref<1x4x256xf32, #tpu.memory_space<vmem>>, vector<1x4x256xf32>
    %1 = vector.shape_cast %0 : vector<1x4x256xf32> to vector<4x256xf32>
    %2 = arith.truncf %1 : vector<4x256xf32> to vector<4x256xbf16>
    %c0_2 = arith.constant 0 : index
    %c0_3 = arith.constant 0 : index
    %3 = vector.load %arg2[%c0_2, %c0_3] : memref<16x4xbf16, #tpu.memory_space<vmem>>, vector<16x4xbf16>
    %cst = arith.constant dense<0.000000e+00> : vector<16x256xf32>
    %4 = tpu.matmul %3, %2, %cst {dimension_numbers = #tpu.dot_dimension_numbers<[1], [0], [0], [1], [0, 0, 1, 1], [], []>} : vector<16x4xbf16>, vector<4x256xbf16>, vector<16x256xf32> -> vector<16x256xf32>
    %5 = vector.extract_strided_slice %4 {offsets = [0, 0], sizes = [8, 256], strides = [1, 1]} : vector<16x256xf32> to vector<8x256xf32>
    %c0_4 = arith.constant 0 : index
    %c0_5 = arith.constant 0 : index
    %6 = vector.load %arg5[%c0_4, %c0_5] : memref<8x4xf32, #tpu.memory_space<vmem>>, vector<8x1xf32>
    %7 = vector.broadcast %6 : vector<8x1xf32> to vector<8x256xf32>
    %8 = arith.addf %5, %7 : vector<8x256xf32>
    %cst_6 = arith.constant 0.000000e+00 : f32
    %9 = vector.broadcast %cst_6 : f32 to vector<8x256xf32>
    %10 = arith.maximumf %8, %9 : vector<8x256xf32>
    %11 = vector.extract_strided_slice %4 {offsets = [8, 0], sizes = [8, 256], strides = [1, 1]} : vector<16x256xf32> to vector<8x256xf32>
    %c0_7 = arith.constant 0 : index
    %c1 = arith.constant 1 : index
    %12 = vector.load %arg5[%c0_7, %c1] : memref<8x4xf32, #tpu.memory_space<vmem>>, vector<8x1xf32>
    %13 = vector.broadcast %12 : vector<8x1xf32> to vector<8x256xf32>
    %14 = arith.addf %11, %13 : vector<8x256xf32>
    %c0_8 = arith.constant 0 : index
    %c0_9 = arith.constant 0 : index
    %15 = vector.load %arg6[%c0_8, %c0_9] : memref<9x256xf32, #tpu.memory_space<vmem>>, vector<9x256xf32>
    %c0_10 = arith.constant 0 : index
    %c0_11 = arith.constant 0 : index
    %16 = vector.load %arg3[%c0_10, %c0_11] : memref<8x72xbf16, #tpu.memory_space<vmem>>, vector<8x72xbf16>
    %c34_i32 = arith.constant 34 : i32
    %17 = tpu.dynamic_rotate %10 by %c34_i32 dim 1 : vector<8x256xf32>, i32 -> vector<8x256xf32>
    %18 = vector.extract_strided_slice %15 {offsets = [0, 0], sizes = [1, 256], strides = [1, 1]} : vector<9x256xf32> to vector<1x256xf32>
    %19 = vector.broadcast %18 : vector<1x256xf32> to vector<8x256xf32>
    %20 = arith.mulf %17, %19 : vector<8x256xf32>
    %c32_i32 = arith.constant 32 : i32
    %21 = tpu.dynamic_rotate %10 by %c32_i32 dim 1 : vector<8x256xf32>, i32 -> vector<8x256xf32>
    %22 = vector.extract_strided_slice %15 {offsets = [1, 0], sizes = [1, 256], strides = [1, 1]} : vector<9x256xf32> to vector<1x256xf32>
    %23 = vector.broadcast %22 : vector<1x256xf32> to vector<8x256xf32>
    %24 = arith.mulf %21, %23 : vector<8x256xf32>
    %c30_i32 = arith.constant 30 : i32
    %25 = tpu.dynamic_rotate %10 by %c30_i32 dim 1 : vector<8x256xf32>, i32 -> vector<8x256xf32>
    %26 = vector.extract_strided_slice %15 {offsets = [2, 0], sizes = [1, 256], strides = [1, 1]} : vector<9x256xf32> to vector<1x256xf32>
    %27 = vector.broadcast %26 : vector<1x256xf32> to vector<8x256xf32>
    %28 = arith.mulf %25, %27 : vector<8x256xf32>
    %c2_i32 = arith.constant 2 : i32
    %29 = tpu.dynamic_rotate %10 by %c2_i32 dim 1 : vector<8x256xf32>, i32 -> vector<8x256xf32>
    %30 = vector.extract_strided_slice %15 {offsets = [3, 0], sizes = [1, 256], strides = [1, 1]} : vector<9x256xf32> to vector<1x256xf32>
    %31 = vector.broadcast %30 : vector<1x256xf32> to vector<8x256xf32>
    %32 = arith.mulf %29, %31 : vector<8x256xf32>
    %c254_i32 = arith.constant 254 : i32
    %33 = tpu.dynamic_rotate %10 by %c254_i32 dim 1 : vector<8x256xf32>, i32 -> vector<8x256xf32>
    %34 = vector.extract_strided_slice %15 {offsets = [5, 0], sizes = [1, 256], strides = [1, 1]} : vector<9x256xf32> to vector<1x256xf32>
    %35 = vector.broadcast %34 : vector<1x256xf32> to vector<8x256xf32>
    %36 = arith.mulf %33, %35 : vector<8x256xf32>
    %c226_i32 = arith.constant 226 : i32
    %37 = tpu.dynamic_rotate %10 by %c226_i32 dim 1 : vector<8x256xf32>, i32 -> vector<8x256xf32>
    %38 = vector.extract_strided_slice %15 {offsets = [6, 0], sizes = [1, 256], strides = [1, 1]} : vector<9x256xf32> to vector<1x256xf32>
    %39 = vector.broadcast %38 : vector<1x256xf32> to vector<8x256xf32>
    %40 = arith.mulf %37, %39 : vector<8x256xf32>
    %c224_i32 = arith.constant 224 : i32
    %41 = tpu.dynamic_rotate %10 by %c224_i32 dim 1 : vector<8x256xf32>, i32 -> vector<8x256xf32>
    %42 = vector.extract_strided_slice %15 {offsets = [7, 0], sizes = [1, 256], strides = [1, 1]} : vector<9x256xf32> to vector<1x256xf32>
    %43 = vector.broadcast %42 : vector<1x256xf32> to vector<8x256xf32>
    %44 = arith.mulf %41, %43 : vector<8x256xf32>
    %c222_i32 = arith.constant 222 : i32
    %45 = tpu.dynamic_rotate %10 by %c222_i32 dim 1 : vector<8x256xf32>, i32 -> vector<8x256xf32>
    %46 = vector.extract_strided_slice %15 {offsets = [8, 0], sizes = [1, 256], strides = [1, 1]} : vector<9x256xf32> to vector<1x256xf32>
    %47 = vector.broadcast %46 : vector<1x256xf32> to vector<8x256xf32>
    %48 = arith.mulf %45, %47 : vector<8x256xf32>
    %49 = tpu.concatenate %20, %24, %28, %32, %10, %36, %40, %44, %48 in 0 : vector<8x256xf32>, vector<8x256xf32>, vector<8x256xf32>, vector<8x256xf32>, vector<8x256xf32>, vector<8x256xf32>, vector<8x256xf32>, vector<8x256xf32>, vector<8x256xf32> -> vector<72x256xf32>
    %50 = arith.truncf %49 : vector<72x256xf32> to vector<72x256xbf16>
    %cst_12 = arith.constant dense<0.000000e+00> : vector<8x256xf32>
    %51 = tpu.matmul %16, %50, %cst_12 {dimension_numbers = #tpu.dot_dimension_numbers<[1], [0], [0], [1], [0, 0, 1, 1], [], []>} : vector<8x72xbf16>, vector<72x256xbf16>, vector<8x256xf32> -> vector<8x256xf32>
    %c0_13 = arith.constant 0 : index
    %c2 = arith.constant 2 : index
    %52 = vector.load %arg5[%c0_13, %c2] : memref<8x4xf32, #tpu.memory_space<vmem>>, vector<8x1xf32>
    %53 = vector.broadcast %52 : vector<8x1xf32> to vector<8x256xf32>
    %54 = arith.addf %51, %53 : vector<8x256xf32>
    %cst_14 = arith.constant 0.000000e+00 : f32
    %55 = vector.broadcast %cst_14 : f32 to vector<8x256xf32>
    %56 = arith.maximumf %54, %55 : vector<8x256xf32>
    %c0_15 = arith.constant 0 : index
    %c0_16 = arith.constant 0 : index
    %57 = vector.load %arg4[%c0_15, %c0_16] : memref<8x8xbf16, #tpu.memory_space<vmem>>, vector<8x8xbf16>
    %58 = arith.truncf %56 : vector<8x256xf32> to vector<8x256xbf16>
    %cst_17 = arith.constant dense<0.000000e+00> : vector<8x256xf32>
    %59 = tpu.matmul %57, %58, %cst_17 {dimension_numbers = #tpu.dot_dimension_numbers<[1], [0], [0], [1], [0, 0, 1, 1], [], []>} : vector<8x8xbf16>, vector<8x256xbf16>, vector<8x256xf32> -> vector<8x256xf32>
    %c0_18 = arith.constant 0 : index
    %c3 = arith.constant 3 : index
    %60 = vector.load %arg5[%c0_18, %c3] : memref<8x4xf32, #tpu.memory_space<vmem>>, vector<8x1xf32>
    %61 = vector.broadcast %60 : vector<8x1xf32> to vector<8x256xf32>
    %62 = arith.addf %59, %61 : vector<8x256xf32>
    %63 = arith.addf %62, %14 : vector<8x256xf32>
    %cst_19 = arith.constant 0.000000e+00 : f32
    %64 = vector.broadcast %cst_19 : f32 to vector<8x256xf32>
    %65 = arith.maximumf %63, %64 : vector<8x256xf32>
    %c0_20 = arith.constant 0 : index
    %c0_21 = arith.constant 0 : index
    %c0_22 = arith.constant 0 : index
    %66 = vector.load %arg7[%c0_20, %c0_21, %c0_22] : memref<1x8x256xf32, #tpu.memory_space<vmem>>, vector<1x8x256xf32>
    %67 = vector.shape_cast %66 : vector<1x8x256xf32> to vector<8x256xf32>
    %68 = vector.shape_cast %65 : vector<8x256xf32> to vector<1x8x256xf32>
    tpu.vector_store %arg7[%c0_20, %c0_21, %c0_22], %68 {strides = array<i32>} : memref<1x8x256xf32, #tpu.memory_space<vmem>>, vector<1x8x256xf32>,
    return
  }
  func.func @transform_0(%arg0: i32) -> (i32, i32, i32) {
    %c0_i32 = arith.constant 0 : i32
    %c0_i32_0 = arith.constant 0 : i32
    %c0_i32_1 = arith.constant 0 : i32
    return %arg0, %c0_i32, %c0_i32_0 : i32, i32, i32
  }
  func.func @transform_1(%arg0: i32) -> (i32, i32) {
    %c0_i32 = arith.constant 0 : i32
    %c0_i32_0 = arith.constant 0 : i32
    %c0_i32_1 = arith.constant 0 : i32
    return %c0_i32, %c0_i32_0 : i32, i32
  }
  func.func @transform_2(%arg0: i32) -> (i32, i32) {
    %c0_i32 = arith.constant 0 : i32
    %c0_i32_0 = arith.constant 0 : i32
    %c0_i32_1 = arith.constant 0 : i32
    return %c0_i32, %c0_i32_0 : i32, i32
  }
  func.func @transform_3(%arg0: i32) -> (i32, i32) {
    %c0_i32 = arith.constant 0 : i32
    %c0_i32_0 = arith.constant 0 : i32
    %c0_i32_1 = arith.constant 0 : i32
    return %c0_i32, %c0_i32_0 : i32, i32
  }
  func.func @transform_4(%arg0: i32) -> (i32, i32) {
    %c0_i32 = arith.constant 0 : i32
    %c0_i32_0 = arith.constant 0 : i32
    %c0_i32_1 = arith.constant 0 : i32
    return %c0_i32, %c0_i32_0 : i32, i32
  }
  func.func @transform_5(%arg0: i32) -> (i32, i32) {
    %c0_i32 = arith.constant 0 : i32
    %c0_i32_0 = arith.constant 0 : i32
    %c0_i32_1 = arith.constant 0 : i32
    return %c0_i32, %c0_i32_0 : i32, i32
  }
  func.func @transform_6(%arg0: i32) -> (i32, i32, i32) {
    %c0_i32 = arith.constant 0 : i32
    %c0_i32_0 = arith.constant 0 : i32
    %c0_i32_1 = arith.constant 0 : i32
    return %arg0, %c0_i32, %c0_i32_0 : i32, i32, i32
  }
}

</mosaic_0001>

<bundles_post_ra>
// kernel: detnet_bottleneck.1
= control target key start
LH: loop header
LB: loop body
LE: loop exit
PB: predicated region body
PF: predicated region fallthrough
CT: control target
= control target key end

     0   :  { %s770_s21 = smov 0   ;;  %s902_s0 = inlined_call_operand.vmem [shape: f32[2,4,256], index: 0, kind: input, shape index: {}]   ;;  %s903_s1 = inlined_call_operand.vmem [shape: bf16[16,4], index: 1, kind: input, shape index: {}]   ;;  %s904_s2 = inlined_call_operand.vmem [shape: bf16[8,72], index: 2, kind: input, shape index: {}]   ;;  %s905_s3 = inlined_call_operand.vmem [shape: bf16[8,8], index: 3, kind: input, shape index: {}]   ;;  %s906_s4 = inlined_call_operand.vmem [shape: f32[8,4], index: 4, kind: input, shape index: {}]   ;;  %s907_s5 = inlined_call_operand.vmem [shape: f32[9,256], index: 5, kind: input, shape index: {}]   ;;  %s908_s6 = inlined_call_operand.vmem [shape: f32[2,8,256], index: 6, kind: output, shape index: {}]  }
   0x1 LB: > { %s666_s22 = sadd.s32 4294967295, %s721_s21   ;;  %p670_p0 = scmp.ge.s32.totalorder %s721_s21, 1  ;;  %s721_s21 = sphi %s770_s21, %s16_s21  }
   0x2   : > { %p212_p1 = scmp.lt.s32.totalorder %s721_s21, 3 }
   0x4   : > { %p213_p2 = pnand %p670_p0, %p212_p1 }
   0x5   : > { %p242_p3 = scmp.lt.s32.totalorder (!%p213_p2), %s666_s22, 1  ;;  %v723_v0 = vmov (!%p213_p2), 0   ;;  %v781_v1 = vld [vmem:[%s906_s4] sm:$0xff] (!%p213_p2)  ;;  %vm270_vm0 = vcmask (!%p213_p2), 1041408   ;;  %vm266_vm1 = vcmask (!%p213_p2), 31744   ;;  %v724_v8 = vmov (!%p213_p2), 1  }
   0x6   : > { %216 = sbr.rel (%p213_p2) target bundleno = 836 (0x344), region = 44  ;;  %309 = vmatprep.mubr.bf16.mxu0 (!%p213_p2), %v723_v0  ;;  %708 = vset.pattern.permute.xlu0 (!%p213_p2), %v723_v0  ;;  %v714_v7 = vld [vmem:[%s903_s1] sm:$0xff] (!%p213_p2)   ;;  %s725_s7 = smov (!%p213_p2), 32   ;;  %v733_v18 = vmov (!%p213_p2), 2   ;;  %v345_v19 = vlaneseq (!%p213_p2)  ;;  %v832_v28 = vld [vmem:[%s907_s5 + $0x8] sm:$0xff] (!%p213_p2)  ;;  %vm497_vm10 = vcmask (!%p213_p2), 1043456  }
   0x7   : > { %323 = vperm.xlu0 (!%p213_p2), %708, %v781_v1   ;;  %536 = vmatprep.mubr.bf16.mxu1 (!%p213_p2), %v723_v0  ;;  %s726_s8 = smov (!%p213_p2), 34   ;;  %s727_s9 = smov (!%p213_p2), 30   ;;  %v827_v27 = vld [vmem:[%s907_s5] sm:$0xff] (!%p213_p2)  ;;  %vm493_vm11 = vcmask (!%p213_p2), 588800   ;;  %vm554_vm12 = vcmask (!%p213_p2), 64512  }
   0x8   : > { %s728_s10 = smov (!%p213_p2), 2   ;;  %s729_s11 = smov (!%p213_p2), 126   ;;  %709 = vset.pattern.permute.xlu1 (!%p213_p2), %v733_v18  ;;  %v819_v22 = vshrl.u32 (!%p213_p2), %v345_v19, 7  ;;  %v821_v23 = vand.u32 (!%p213_p2), 127, %v345_v19 }
   0x9   : > { %s730_s12 = smov (!%p213_p2), 98   ;;  %s731_s13 = smov (!%p213_p2), 96  }
   0xa   : > { %s732_s14 = smov (!%p213_p2), 94   ;;  %v369_v25 = vsub.s32 (!%p213_p2), 1, %v819_v22  ;;  %vm364_vm2 = vcmp.lt.s32.totalorder (!%p213_p2), %v821_v23, 32  ;;  %v403_v29 = vsub.s32 (!%p213_p2), 3, %v819_v22  ;;  %v352_v30 = vsub.s32 (!%p213_p2), 0, %v819_v22 }
   0xb   : > { %710 = vset.pattern.permute.xlu0 (!%p213_p2), %v724_v8  ;;  %v386_v31 = vsub.s32 (!%p213_p2), 2, %v819_v22  ;;  %v420_v35 = vsub.s32 (!%p213_p2), 5, %v819_v22  ;;  %vm381_vm3 = vcmp.lt.s32.totalorder (!%p213_p2), %v821_v23, 30  ;;  %vm398_vm4 = vcmp.lt.s32.totalorder (!%p213_p2), %v821_v23, 2 }
   0xc   : > { %v370_v32 = vrot.slane (!%p213_p2), %v827_v27, %v369_v25  ;;  %v374_v36 = vrot.slane (!%p213_p2), %v832_v28, %v369_v25  ;;  %v408_v39 = vrot.slane (!%p213_p2), %v832_v28, %v403_v29  ;;  %vm347_vm5 = vcmp.lt.s32.totalorder (!%p213_p2), %v821_v23, 34 }
   0xd   : > { %s910_s22 = smov (!%p242_p3, %s666_s22), 1  ;;  %v353_v40 = vrot.slane %v827_v27, %v352_v30  ;;  %v357_v41 = vrot.slane %v832_v28, %v352_v30  ;;  %v391_v42 = vrot.slane %v832_v28, %v386_v31  ;;  %v404_v43 = vrot.slane %v827_v27, %v403_v29 }
   0xe   : > { %s686_s25 = sshll.u32 %s910_s22, 3  ;;  %vm415_vm6 = vcmp.lt.s32.totalorder %v821_v23, 126  ;;  %v425_v47 = vrot.slane %v832_v28, %v420_v35  ;;  %v387_v57 = vrot.slane %v827_v27, %v386_v31  ;;  %v454_v8 = vsub.s32 7, %v819_v22  ;;  %s687_s29 = sshll.u32 %s910_s22, 4 }
   0xf   : > { %s246_s28 = scalar_lea.vmem %s902_s0, %s686_s25  ;;  %vm432_vm7 = vcmp.lt.s32.totalorder %v821_v23, 98  ;;  %vm449_vm8 = vcmp.lt.s32.totalorder %v821_v23, 96  ;;  %vm466_vm9 = vcmp.lt.s32.totalorder %v821_v23, 94 }
  0x10   : > { %v253_v2 = vld [vmem:[%s246_s28] sm:$0xff] }
  0x11   : > { %v255_v3 = vcombine.high %v253_v2, %v253_v2  ;;  %v257_v4 = vpack.c.bf16 %v253_v2, %v253_v2  ;;  %v421_v2 = vrot.slane %v827_v27, %v420_v35 }
  0x13   : > { %v258_v5 = vpack.c.bf16 %v255_v3, %v255_v3  ;;  %v272_v6 = vsel %vm270_vm0, %v257_v4, 0  ;;  %v437_v4 = vsub.s32 6, %v819_v22  ;;  %v459_v22 = vrot.slane %v832_v28, %v454_v8 }
  0x15   : > { %676 = vmatprep.subr.msk.bf16.mxu0 %vm270_vm0, %v258_v5  ;;  %v442_v18 = vrot.slane %v832_v28, %v437_v4  ;;  %v679_v28 = vld [vmem:[%s907_s5 + $0x18] ss:$0 sm:$0xff] }
  0x16   : > { %278 = vmatpush1.bf16.msra.mxu0 %v272_v6 }
  0x19   : > { %677 = vmatmul.mubr.msk.bf16.vlgmr.msra.gmra.mrb[0].mxu0 %vm266_vm1, %v714_v7 }
  0x1a   : > { %596 = vmatprep.mubr.bf16.mxu0 %v723_v0 }
  0x86   : > { %v324_v9 = vpop.permute.xlu0 %323 }
  0xec   : > { %v311_v10 = vpop.f32.mrb[0].mxu0 }
  0xed   : > { %v326_v11 = vadd.f32 %v324_v9, %v311_v10  ;;  %v313_v12 = vpop.f32.mrb[1].mxu0 }
  0xee   : > { %v793_v13 = vpop.f32.mrb[2].mxu0  ;;  %v327_v15 = vadd.f32 %v324_v9, %v313_v12 }
  0xef   : > { %v795_v14 = vmax.f32 %v326_v11, 0.0  ;;  %v797_v16 = vpop.f32.mrb[3].mxu0 }
  0xf0   : > { %v801_v17 = vmax.f32 %v327_v15, 0.0  ;;  %v438_v15 = vrot.slane %v827_v27, %v437_v4 }
  0xf1   : > { %360 = vrot.lane.b32.xlu1 %v795_v14, %s725_s7  ;;  %341 = vrot.lane.b32.xlu0 %v795_v14, %s726_s8 }
  0xf5   : > { %377 = vrot.lane.b32.xlu1 %v795_v14, %s727_s9  ;;  %362 = vrot.lane.b32.xlu0 %v801_v17, %s725_s7 }
  0xf9   : > { %394 = vrot.lane.b32.xlu1 %v795_v14, %s728_s10  ;;  %379 = vrot.lane.b32.xlu0 %v801_v17, %s727_s9 }
  0xfd   : > { %396 = vrot.lane.b32.xlu0 %v801_v17, %s728_s10  ;;  %343 = vrot.lane.b32.xlu1 %v801_v17, %s726_s8  ;;  %s251_s8 = scalar_lea.vmem %s908_s6, %s687_s29 }
 0x101   : > { %413 = vrot.lane.b32.xlu0 %v801_v17, %s729_s11  ;;  %411 = vrot.lane.b32.xlu1 %v795_v14, %s729_s11 }
 0x105   : > { %430 = vrot.lane.b32.xlu0 %v801_v17, %s730_s12  ;;  %428 = vrot.lane.b32.xlu1 %v795_v14, %s730_s12 }
 0x109   : > { %447 = vrot.lane.b32.xlu0 %v801_v17, %s731_s13  ;;  %445 = vrot.lane.b32.xlu1 %v795_v14, %s731_s13 }
 0x10d   : > { %464 = vrot.lane.b32.xlu0 %v801_v17, %s732_s14  ;;  %462 = vrot.lane.b32.xlu1 %v795_v14, %s732_s14 }
 0x111   : > { %331 = vperm.xlu0 %710, %v781_v1   ;;  %490 = vperm.xlu1 %709, %v781_v1  }
 0x163   : > { %v361_v20 = vpop.permute.xlu1 %360  ;;  %v342_v21 = vpop.permute.xlu0 %341 }
 0x167   : > { %v378_v24 = vpop.permute.xlu1 %377  ;;  %v363_v26 = vpop.permute.xlu0 %362 }
 0x168   : > { %v365_v37 = vsel %vm364_vm2, %v361_v20, %v363_v26  ;;  %v366_v38 = vsel %vm364_vm2, %v363_v26, %v361_v20 }
 0x169   : > { %v375_v44 = vmul.f32 %v370_v32, %v366_v38  ;;  %v376_v48 = vmul.f32 %v374_v36, %v365_v37 }
 0x16b   : > { %v395_v33 = vpop.permute.xlu1 %394  ;;  %v380_v34 = vpop.permute.xlu0 %379 }
 0x16c   : > { %v382_v49 = vsel %vm381_vm3, %v378_v24, %v380_v34  ;;  %v383_v58 = vsel %vm381_vm3, %v380_v34, %v378_v24 }
 0x16d   : > { %v393_v59 = vmul.f32 %v391_v42, %v382_v49  ;;  %v392_v9 = vmul.f32 %v387_v57, %v383_v58 }
 0x16f   : > { %v397_v45 = vpop.permute.xlu0 %396  ;;  %v344_v46 = vpop.permute.xlu1 %343 }
 0x170   : > { %v399_v50 = vsel %vm398_vm4, %v395_v33, %v397_v45  ;;  %v348_v51 = vsel %vm347_vm5, %v342_v21, %v344_v46  ;;  %v349_v52 = vsel %vm347_vm5, %v344_v46, %v342_v21  ;;  %v400_v53 = vsel %vm398_vm4, %v397_v45, %v395_v33  ;;  %v340_v45 = vld [vmem:[%s904_s2] sm:$0xf] }
 0x171   : > { %v410_v54 = vmul.f32 %v408_v39, %v399_v50  ;;  %v358_v55 = vmul.f32 %v353_v40, %v349_v52  ;;  %v359_v56 = vmul.f32 %v357_v41, %v348_v51  ;;  %v409_v0 = vmul.f32 %v404_v43, %v400_v53 }
 0x172   : > { %v455_v21 = vrot.slane %v827_v27, %v454_v8  ;;  %v678_v27 = vld [vmem:[%s907_s5 + $0x10] ss:$0 sm:$0xff]  ;;  %v734_v46 = vmov 3  }
 0x173   : > { %v414_v60 = vpop.permute.xlu0 %413  ;;  %v412_v61 = vpop.permute.xlu1 %411  ;;  %v480_v62 = vpack.c.bf16 %v376_v48, %v359_v56  ;;  %v479_v63 = vpack.c.bf16 %v375_v44, %v358_v55  ;;  %v482_v7 = vpack.c.bf16 %v410_v54, %v393_v59  ;;  %v481_v19 = vpack.c.bf16 %v409_v0, %v392_v9  ;;  %711 = vset.pattern.permute.xlu1 %v734_v46 }
 0x174   : > { %v417_v3 = vsel %vm415_vm6, %v414_v60, %v412_v61  ;;  %v416_v5 = vsel %vm415_vm6, %v412_v61, %v414_v60  ;;  %712 = vset.pattern.permute.xlu0 %v734_v46  ;;  %551 = vperm.xlu1 %711, %v781_v1   ;;  %v547_v1 = vld [vmem:[%s905_s3] sm:$0xf] }
 0x175   : > { %v427_v6 = vmul.f32 %v425_v47, %v417_v3  ;;  %504 = vmatprep.subr.bf16.mxu1 %v480_v62  ;;  %v426_v12 = vmul.f32 %v421_v2, %v416_v5 }
 0x176   : > { %505 = vmatpush1.bf16.msra.mxu1 %v479_v63 }
 0x177   : > { %v431_v10 = vpop.permute.xlu0 %430  ;;  %506 = vmatprep.subr.bf16.mxu1 %v482_v7  ;;  %v429_v11 = vpop.permute.xlu1 %428  ;;  %v484_v20 = vpack.c.bf16 %v427_v6, %v801_v17  ;;  %v483_v32 = vpack.c.bf16 %v426_v12, %v795_v14 }
 0x178   : > { %v433_v24 = vsel %vm432_vm7, %v429_v11, %v431_v10  ;;  %v434_v25 = vsel %vm432_vm7, %v431_v10, %v429_v11 }
 0x179   : > { %v443_v33 = vmul.f32 %v438_v15, %v433_v24  ;;  %v444_v17 = vmul.f32 %v442_v18, %v434_v25 }
 0x17a   : > { %507 = vmatpush1.bf16.msra.mxu1 %v481_v19 }
 0x17b   : > { %v448_v26 = vpop.permute.xlu0 %447  ;;  %508 = vmatprep.subr.bf16.mxu1 %v484_v20  ;;  %v446_v29 = vpop.permute.xlu1 %445 }
 0x17c   : > { %v450_v30 = vsel %vm449_vm8, %v446_v29, %v448_v26  ;;  %v451_v31 = vsel %vm449_vm8, %v448_v26, %v446_v29 }
 0x17d   : > { %v460_v34 = vmul.f32 %v455_v21, %v450_v30  ;;  %v461_v35 = vmul.f32 %v459_v22, %v451_v31 }
 0x17e   : > { %509 = vmatpush1.bf16.msra.mxu1 %v483_v32 }
 0x17f   : > { %v465_v36 = vpop.permute.xlu0 %464  ;;  %v463_v37 = vpop.permute.xlu1 %462  ;;  %v486_v38 = vpack.c.bf16 %v461_v35, %v444_v17  ;;  %v485_v39 = vpack.c.bf16 %v460_v34, %v443_v33 }
 0x180   : > { %v467_v14 = vsel %vm466_vm9, %v463_v37, %v465_v36  ;;  %v468_v40 = vsel %vm466_vm9, %v465_v36, %v463_v37 }
 0x181   : > { %v477_v23 = vmul.f32 %v678_v27, %v467_v14  ;;  %v478_v41 = vmul.f32 %v679_v28, %v468_v40  ;;  %510 = vmatprep.subr.bf16.mxu1 %v486_v38 }
 0x182   : > { %511 = vmatpush1.bf16.msra.mxu1 %v485_v39 }
 0x183   : > { %v487_v42 = vpack.c.bf16 %v477_v23, %v477_v23  ;;  %v488_v43 = vpack.c.bf16 %v478_v41, %v478_v41 }
 0x185   : > { %680 = vmatprep.subr.msk.bf16.mxu1 %vm497_vm10, %v488_v43  ;;  %v499_v44 = vsel %vm497_vm10, %v487_v42, 0 }
 0x186   : > { %513 = vmatpush1.bf16.msra.mxu1 %v499_v44 }
 0x189   : > { %681 = vmatmul.mubr.msk.bf16.vlgmr.msra.gmra.mrb[0].mxu1 %vm493_vm11, %v340_v45 }
 0x190   : > { %v491_v47 = vpop.permute.xlu1 %490  ;;  %v332_v59 = vpop.permute.xlu0 %331 }
 0x191   : > { %v334_v62 = vadd.f32 %v332_v59, %v793_v13  ;;  %v335_v2 = vadd.f32 %v332_v59, %v797_v16 }
 0x1f3   : > { %v552_v60 = vpop.permute.xlu1 %551 }
 0x25c   : > { %v538_v48 = vpop.f32.mrb[0].mxu1 }
 0x25d   : > { %v539_v49 = vadd.f32 %v538_v48, %v491_v47  ;;  %v540_v50 = vpop.f32.mrb[1].mxu1 }
 0x25e   : > { %v541_v51 = vadd.f32 %v540_v50, %v491_v47  ;;  %v542_v52 = vpop.f32.mrb[2].mxu1 }
 0x25f   : > { %v545_v53 = vmax.f32 %v539_v49, 0.0  ;;  %v543_v54 = vpop.f32.mrb[3].mxu1 }
 0x260   : > { %v546_v55 = vmax.f32 %v541_v51, 0.0 }
 0x261   : > { %v548_v56 = vpack.c.bf16 %v545_v53, %v545_v53 }
 0x262   : > { %v549_v57 = vpack.c.bf16 %v546_v55, %v546_v55 }
 0x263   : > { %v559_v58 = vsel %vm497_vm10, %v548_v56, 0 }
 0x264   : > { %682 = vmatprep.subr.msk.bf16.mxu0 %vm497_vm10, %v549_v57 }
 0x265   : > { %565 = vmatpush1.bf16.msra.mxu0 %v559_v58 }
 0x268   : > { %683 = vmatmul.mubr.msk.bf16.vlgmr.msra.gmra.mrb[4].mxu0 %vm554_vm12, %v547_v1 }
 0x33b   : > { %v598_v61 = vpop.f32.mrb[4].mxu0 }
 0x33c   : > { %v599_v63 = vadd.f32 %v598_v61, %v552_v60  ;;  %v600_v0 = vpop.f32.mrb[5].mxu0 }
 0x33d   : > { %v601_v3 = vadd.f32 %v600_v0, %v552_v60  ;;  %v602_v4 = vpop.f32.mrb[6].mxu0 }
 0x33e   : > { %v605_v5 = vadd.f32 %v599_v63, %v334_v62  ;;  %v603_v6 = vpop.f32.mrb[7].mxu0 }
 0x33f   : > { %v606_v7 = vadd.f32 %v601_v3, %v335_v2 }
 0x340   : > { %v607_v8 = vmax.f32 %v605_v5, 0.0 }
 0x341   : > { %v608_v9 = vmax.f32 %v606_v7, 0.0 }
 0x342   : > { %609 = vst [vmem:[%s251_s8] sm:$0xff] %v607_v8 }
 0x343   : > { %610 = vst [vmem:[%s251_s8 + $0x8] sm:$0xff] %v608_v9 }
 0x344 PF: > { %s16_s21 = sadd.s32 1, %s721_s21  }
 0x345   : > { %p13_p4 = scmp.ge.s32.totalorder %s16_s21, 4  }
 0x347   :  { %15 = sbr.rel (!%p13_p4) target bundleno = 1 (0x1), region = 74 }

</bundles_post_ra>
